<compile_context>
chip_gen: v5e
topology: v5e:2x2
jax: 0.10.0
libtpu: 0.0.40
codegen_flags: <defaults>
</compile_context>

<pallas_src>
import jax
import jax.numpy as jnp
import numpy as np
from jax.experimental import pallas as pl
from jax.experimental.pallas import tpu as pltpu


TILE_B_DEFAULT = 1024  # batch tile; multiple of 8, safe for v5e/v6e/v7x VMEM budgets


def _mlp_kernel(x_ref, w1_ref, b1_ref, w2_ref, b2_ref, w3_ref, b3_ref, out_ref):
    x = x_ref[...]

    # Layer 1: Linear(56 -> 128) + ReLU   (MXU matmul, f32 accumulation)
    h1 = jnp.dot(x, w1_ref[...], preferred_element_type=jnp.float32) + b1_ref[...]
    h1 = jnp.maximum(h1, 0.0)

    # Layer 2: Linear(128 -> 256) + ReLU
    h2 = jnp.dot(h1, w2_ref[...], preferred_element_type=jnp.float32) + b2_ref[...]
    h2 = jnp.maximum(h2, 0.0)

    # Layer 3: Linear(256 -> 128 padded), no activation (cols 121..127 are zero-padded)
    out = jnp.dot(h2, w3_ref[...], preferred_element_type=jnp.float32) + b3_ref[...]
    out_ref[...] = out.astype(out_ref.dtype)


def network_forward(x, params, tile_b=TILE_B_DEFAULT):
    """x: (B, 56) float32.  params: dict of w1,b1,w2,b2,w3,b3 (weights (in,out), bias (1,out))."""
    B, f_in = x.shape
    w1, b1 = params["w1"], params["b1"]
    w2, b2 = params["w2"], params["b2"]
    w3, b3 = params["w3"], params["b3"]
    out_f = w3.shape[1]  # 121

    # --- pad output features to a lane-dense multiple of 128 (unmasked stores) ---
    out_pad = ((out_f + 127) // 128) * 128
    if out_pad != out_f:
        w3p = jnp.pad(w3, ((0, 0), (0, out_pad - out_f)))
        b3p = jnp.pad(b3, ((0, 0), (0, out_pad - out_f)))
    else:
        w3p, b3p = w3, b3

    # --- choose batch tile (multiple of 8, capped at tile_b) and pad the batch ---
    tb = min(tile_b, ((B + 7) // 8) * 8)
    tb = max(8, ((tb + 7) // 8) * 8)
    n_tiles = pl.cdiv(B, tb)
    b_pad = n_tiles * tb
    x_p = jnp.pad(x, ((0, b_pad - B), (0, 0))) if b_pad != B else x

    # weights/biases: constant index_map -> VMEM-resident, DMA'd once
    resident = lambda shape: pl.BlockSpec(shape, lambda i: tuple(0 for _ in shape))

    out_padded = pl.pallas_call(
        _mlp_kernel,
        out_shape=jax.ShapeDtypeStruct((b_pad, out_pad), jnp.float32),
        grid=(n_tiles,),
        in_specs=[
            pl.BlockSpec((tb, f_in), lambda i: (i, 0)),   # x: tiled over batch
            resident(w1.shape), resident(b1.shape),
            resident(w2.shape), resident(b2.shape),
            resident(w3p.shape), resident(b3p.shape),
        ],
        out_specs=pl.BlockSpec((tb, out_pad), lambda i: (i, 0)),
        compiler_params=pltpu.CompilerParams(
            dimension_semantics=("parallel",),            # megacore sharding on v7x
        ),
    )(x_p, w1, b1, w2, b2, w3p, b3p)

    # slice off batch padding and the 7 padded output columns
    return out_padded[:B, :out_f]


def init_params(key):
    """Deterministic parameter init (PyTorch-Linear-style uniform bounds)."""
    def linear(key, fan_in, fan_out):
        kw, kb = jax.random.split(key)
        bound = 1.0 / np.sqrt(fan_in)
        w = jax.random.uniform(kw, (fan_in, fan_out), jnp.float32, -bound, bound)
        b = jax.random.uniform(kb, (1, fan_out), jnp.float32, -bound, bound)
        return w, b

    k1, k2, k3 = jax.random.split(key, 3)
    w1, b1 = linear(k1, 56, 128)
    w2, b2 = linear(k2, 128, 256)
    w3, b3 = linear(k3, 256, 121)
    return {"w1": w1, "b1": b1, "w2": w2, "b2": b2, "w3": w3, "b3": b3}


def network_forward_ref(x, p):
    h1 = jnp.maximum(x @ p["w1"] + p["b1"], 0.0)
    h2 = jnp.maximum(h1 @ p["w2"] + p["b2"], 0.0)
    return h2 @ p["w3"] + p["b3"]


if __name__ == "__main__":
    key = jax.random.PRNGKey(0)
    k_params, k_x1, k_x2 = jax.random.split(key, 3)
    params = init_params(k_params)

    # Small test, shapes consistent with the module: batch=8, features=56
    x_small = jax.random.normal(k_x1, (8, 56), dtype=jnp.float32)
    out_small = jax.block_until_ready(network_forward(x_small, params))
    ref_small = jax.block_until_ready(network_forward_ref(x_small, params))
    assert out_small.shape == (8, 121), out_small.shape
    np.testing.assert_allclose(np.asarray(out_small), np.asarray(ref_small),
                               rtol=1e-5, atol=1e-5)

    # Exercise the batch grid + remainder padding path (B not a multiple of the tile)
    x_big = jax.random.normal(k_x2, (300, 56), dtype=jnp.float32)
    out_big = jax.block_until_ready(network_forward(x_big, params, tile_b=128))
    ref_big = jax.block_until_ready(network_forward_ref(x_big, params))
    assert out_big.shape == (300, 121), out_big.shape
    np.testing.assert_allclose(np.asarray(out_big), np.asarray(ref_big),
                               rtol=1e-5, atol=1e-5)

    print("KERNEL_OK")
</pallas_src>

<mosaic_0001>
module attributes {stable_mosaic.version = 11 : i64} {
  func.func @_mlp_kernel(%arg0: i32, %arg1: memref<8x56xf32, #tpu.memory_space<vmem>>, %arg2: memref<56x128xf32, #tpu.memory_space<vmem>>, %arg3: memref<1x128xf32, #tpu.memory_space<vmem>>, %arg4: memref<128x256xf32, #tpu.memory_space<vmem>>, %arg5: memref<1x256xf32, #tpu.memory_space<vmem>>, %arg6: memref<256x128xf32, #tpu.memory_space<vmem>>, %arg7: memref<1x128xf32, #tpu.memory_space<vmem>>, %arg8: memref<8x128xf32, #tpu.memory_space<vmem>>) attributes {dimension_semantics = [#tpu.dimension_semantics<parallel>], iteration_bounds = array<i64: 1>, scalar_prefetch = 0 : i64, scratch_operands = 0 : i64, tpu.core_type = #tpu.core_type<tc>, window_params = [{transform_indices = @transform_0, window_bounds = array<i64: 8, 56>}, {pipeline_mode = #tpu.pipeline_mode<synchronous>, transform_indices = @transform_1, window_bounds = array<i64: 56, 128>}, {pipeline_mode = #tpu.pipeline_mode<synchronous>, transform_indices = @transform_2, window_bounds = array<i64: 1, 128>}, {pipeline_mode = #tpu.pipeline_mode<synchronous>, transform_indices = @transform_3, window_bounds = array<i64: 128, 256>}, {pipeline_mode = #tpu.pipeline_mode<synchronous>, transform_indices = @transform_4, window_bounds = array<i64: 1, 256>}, {pipeline_mode = #tpu.pipeline_mode<synchronous>, transform_indices = @transform_5, window_bounds = array<i64: 256, 128>}, {pipeline_mode = #tpu.pipeline_mode<synchronous>, transform_indices = @transform_6, window_bounds = array<i64: 1, 128>}, {transform_indices = @transform_7, window_bounds = array<i64: 8, 128>}]} {
    %c0 = arith.constant 0 : index
    %c0_0 = arith.constant 0 : index
    %0 = vector.load %arg1[%c0, %c0_0] : memref<8x56xf32, #tpu.memory_space<vmem>>, vector<8x56xf32>
    %c0_1 = arith.constant 0 : index
    %c0_2 = arith.constant 0 : index
    %1 = vector.load %arg2[%c0_1, %c0_2] : memref<56x128xf32, #tpu.memory_space<vmem>>, vector<56x128xf32>
    %cst = arith.constant dense<0.000000e+00> : vector<8x128xf32>
    %2 = tpu.matmul %0, %1, %cst {dimension_numbers = #tpu.dot_dimension_numbers<[1], [0], [0], [1], [0, 0, 1, 1], [], []>} : vector<8x56xf32>, vector<56x128xf32>, vector<8x128xf32> -> vector<8x128xf32>
    %c0_3 = arith.constant 0 : index
    %c0_4 = arith.constant 0 : index
    %3 = vector.load %arg3[%c0_3, %c0_4] : memref<1x128xf32, #tpu.memory_space<vmem>>, vector<1x128xf32>
    %4 = vector.broadcast %3 : vector<1x128xf32> to vector<8x128xf32>
    %5 = arith.addf %2, %4 : vector<8x128xf32>
    %cst_5 = arith.constant 0.000000e+00 : f32
    %6 = vector.broadcast %cst_5 : f32 to vector<8x128xf32>
    %7 = arith.maximumf %5, %6 : vector<8x128xf32>
    %c0_6 = arith.constant 0 : index
    %c0_7 = arith.constant 0 : index
    %8 = vector.load %arg4[%c0_6, %c0_7] : memref<128x256xf32, #tpu.memory_space<vmem>>, vector<128x256xf32>
    %cst_8 = arith.constant dense<0.000000e+00> : vector<8x256xf32>
    %9 = tpu.matmul %7, %8, %cst_8 {dimension_numbers = #tpu.dot_dimension_numbers<[1], [0], [0], [1], [0, 0, 1, 1], [], []>} : vector<8x128xf32>, vector<128x256xf32>, vector<8x256xf32> -> vector<8x256xf32>
    %c0_9 = arith.constant 0 : index
    %c0_10 = arith.constant 0 : index
    %10 = vector.load %arg5[%c0_9, %c0_10] : memref<1x256xf32, #tpu.memory_space<vmem>>, vector<1x256xf32>
    %11 = vector.broadcast %10 : vector<1x256xf32> to vector<8x256xf32>
    %12 = arith.addf %9, %11 : vector<8x256xf32>
    %cst_11 = arith.constant 0.000000e+00 : f32
    %13 = vector.broadcast %cst_11 : f32 to vector<8x256xf32>
    %14 = arith.maximumf %12, %13 : vector<8x256xf32>
    %c0_12 = arith.constant 0 : index
    %c0_13 = arith.constant 0 : index
    %15 = vector.load %arg6[%c0_12, %c0_13] : memref<256x128xf32, #tpu.memory_space<vmem>>, vector<256x128xf32>
    %cst_14 = arith.constant dense<0.000000e+00> : vector<8x128xf32>
    %16 = tpu.matmul %14, %15, %cst_14 {dimension_numbers = #tpu.dot_dimension_numbers<[1], [0], [0], [1], [0, 0, 1, 1], [], []>} : vector<8x256xf32>, vector<256x128xf32>, vector<8x128xf32> -> vector<8x128xf32>
    %c0_15 = arith.constant 0 : index
    %c0_16 = arith.constant 0 : index
    %17 = vector.load %arg7[%c0_15, %c0_16] : memref<1x128xf32, #tpu.memory_space<vmem>>, vector<1x128xf32>
    %18 = vector.broadcast %17 : vector<1x128xf32> to vector<8x128xf32>
    %19 = arith.addf %16, %18 : vector<8x128xf32>
    %c0_17 = arith.constant 0 : index
    %c0_18 = arith.constant 0 : index
    %20 = vector.load %arg8[%c0_17, %c0_18] : memref<8x128xf32, #tpu.memory_space<vmem>>, vector<8x128xf32>
    tpu.vector_store %arg8[%c0_17, %c0_18], %19 {strides = array<i32>} : memref<8x128xf32, #tpu.memory_space<vmem>>, vector<8x128xf32>,
    return
  }
  func.func @transform_0(%arg0: i32) -> (i32, i32) {
    %c0_i32 = arith.constant 0 : i32
    %c0_i32_0 = arith.constant 0 : i32
    return %arg0, %c0_i32 : i32, i32
  }
  func.func @transform_1(%arg0: i32) -> (i32, i32) {
    %c0_i32 = arith.constant 0 : i32
    %c0_i32_0 = arith.constant 0 : i32
    %c0_i32_1 = arith.constant 0 : i32
    return %c0_i32, %c0_i32_0 : i32, i32
  }
  func.func @transform_2(%arg0: i32) -> (i32, i32) {
    %c0_i32 = arith.constant 0 : i32
    %c0_i32_0 = arith.constant 0 : i32
    %c0_i32_1 = arith.constant 0 : i32
    return %c0_i32, %c0_i32_0 : i32, i32
  }
  func.func @transform_3(%arg0: i32) -> (i32, i32) {
    %c0_i32 = arith.constant 0 : i32
    %c0_i32_0 = arith.constant 0 : i32
    %c0_i32_1 = arith.constant 0 : i32
    return %c0_i32, %c0_i32_0 : i32, i32
  }
  func.func @transform_4(%arg0: i32) -> (i32, i32) {
    %c0_i32 = arith.constant 0 : i32
    %c0_i32_0 = arith.constant 0 : i32
    %c0_i32_1 = arith.constant 0 : i32
    return %c0_i32, %c0_i32_0 : i32, i32
  }
  func.func @transform_5(%arg0: i32) -> (i32, i32) {
    %c0_i32 = arith.constant 0 : i32
    %c0_i32_0 = arith.constant 0 : i32
    %c0_i32_1 = arith.constant 0 : i32
    return %c0_i32, %c0_i32_0 : i32, i32
  }
  func.func @transform_6(%arg0: i32) -> (i32, i32) {
    %c0_i32 = arith.constant 0 : i32
    %c0_i32_0 = arith.constant 0 : i32
    %c0_i32_1 = arith.constant 0 : i32
    return %c0_i32, %c0_i32_0 : i32, i32
  }
  func.func @transform_7(%arg0: i32) -> (i32, i32) {
    %c0_i32 = arith.constant 0 : i32
    %c0_i32_0 = arith.constant 0 : i32
    return %arg0, %c0_i32 : i32, i32
  }
}

</mosaic_0001>

<bundles_post_ra>
// kernel: tpu_custom_call.1
= control target key start
LH: loop header
LB: loop body
LE: loop exit
PB: predicated region body
PF: predicated region fallthrough
CT: control target
= control target key end

     0   :  { %12 = vsyncpa [#allocation3], 0  ;;  %s514_s0 = inlined_call_operand.hbm [shape: f32[8,56], index: 0, kind: input, shape index: {}]   ;;  %s515_s1 = inlined_call_operand.hbm [shape: f32[56,128], index: 1, kind: input, shape index: {}]   ;;  %s516_s2 = inlined_call_operand.vmem [shape: f32[1,128], index: 2, kind: input, shape index: {}]   ;;  %s517_s3 = inlined_call_operand.hbm [shape: f32[128,256], index: 3, kind: input, shape index: {}]   ;;  %s518_s4 = inlined_call_operand.vmem [shape: f32[1,256], index: 4, kind: input, shape index: {}]   ;;  %s519_s5 = inlined_call_operand.hbm [shape: f32[256,128], index: 5, kind: input, shape index: {}]   ;;  %s520_s6 = inlined_call_operand.vmem [shape: f32[1,128], index: 6, kind: input, shape index: {}]   ;;  %s521_s7 = inlined_call_operand.hbm [shape: f32[8,128], index: 7, kind: output, shape index: {}]  }
   0x1   :  { %13 = vsyncpa [#allocation6], 0 }
   0x2   :  { %14 = vsyncpa [#allocation9], 0  ;;  %s31_s26 = sshll.u32 %s515_s1, 4  ;;  %s32_s26 = int_to_ptr.hbm [resolvable:$true] %s31_s26 }
   0x3   :  { %15 = vsyncpa [#allocation4], 0  ;;  %s441_s27 = smov [#allocation5]   ;;  %s21_s8 = sshll.u32 %s514_s0, 4  ;;  %s22_s8 = int_to_ptr.hbm [resolvable:$true] %s21_s8 }
   0x4   :  { %s33_s28 = sshll.u32 %s441_s27, 4  ;;  %s442_s9 = smov 128   ;;  %s34_s28 = int_to_ptr.vmem [resolvable:$true] %s33_s28 }
   0x5   :  { %s443_s10 = smov 8   ;;  %s444_s11 = smov [#allocation2]  }
   0x6   :  { %39 = dma.hbm_to_vmem [thread:$0]  %s32_s26, 896, %s34_s28, [#allocation6], %s442_s9, %s442_s9, %s443_s10  }
   0x7   :  { %s23_s12 = sshll.u32 %s444_s11, 4  ;;  %s46_s15 = sshll.u32 %s517_s3, 4  ;;  %s24_s12 = int_to_ptr.vmem [resolvable:$true] %s23_s12  ;;  %s47_s15 = int_to_ptr.hbm [resolvable:$true] %s46_s15 }
   0x8   :  { %26 = dma.hbm_to_vmem [thread:$0]  %s22_s8, 128, %s24_s12, [#allocation3]  }
   0x9   :  { %s445_s1 = smov [#allocation7]   ;;  %s61_s0 = sshll.u32 %s519_s5, 4  ;;  %s62_s0 = int_to_ptr.hbm [resolvable:$true] %s61_s0 }
   0xa   :  { %s48_s16 = sshll.u32 %s445_s1, 4  ;;  %s446_s19 = smov 256   ;;  %s49_s16 = int_to_ptr.vmem [resolvable:$true] %s48_s16 }
   0xb   :  { %s447_s20 = smov 16   ;;  %s448_s21 = smov [#allocation8]  }
   0xc   :  { %54 = dma.hbm_to_vmem [thread:$0]  %s47_s15, 4096, %s49_s16, [#allocation6], %s446_s19, %s446_s19, %s447_s20  }
   0xd   :  { %s63_s22 = sshll.u32 %s448_s21, 4  ;;  %s64_s22 = int_to_ptr.vmem [resolvable:$true] %s63_s22 }
   0xe   :  { %69 = dma.hbm_to_vmem [thread:$0]  %s62_s0, 4096, %s64_s22, [#allocation9], %s442_s9, %s442_s9, %s443_s10  }
   0xf   :  { %433 = dma.done.wait [#allocation3], 128  }
  0x10   :  { %434 = vsyncadd [#allocation3], 4294967168 }
  0x11   :  { %435 = dma.done.wait [#allocation6], 4992  }
  0x12   :  { %436 = vsyncadd [#allocation6], 4294962304 }
  0x13   :  { %437 = dma.done.wait [#allocation9], 4096  }
  0x14   :  { %438 = vsyncadd [#allocation9], 4294963200  ;;  %v95_v0 = vld [vmem:[#allocation5 + $0x30] sm:$0xff]  ;;  %v94_v1 = vld [vmem:[#allocation5 + $0x28] sm:$0xff]  ;;  %vm100_vm0 = vcmask 457728   ;;  %s449_s26 = smov [#allocation10]  }
  0x15   :  { %113 = vmatpush.msra.mxu0 %v95_v0  ;;  %v93_v2 = vld [vmem:[#allocation5 + $0x20] sm:$0xff]  ;;  %v155_v3 = vld [vmem:[#allocation7 + $0xf0] sm:$0xff]  ;;  %v156_v4 = vld [vmem:[#allocation7 + $0xf8] sm:$0xff]  ;;  %s287_s27 = sshll.u32 %s449_s26, 4  ;;  %s288_s27 = int_to_ptr.vmem [resolvable:$true] %s287_s27 }
  0x16   :  { %163 = vmatpush.msra.mxu1 %v155_v3  ;;  %v153_v5 = vld [vmem:[#allocation7 + $0xe0] sm:$0xff]  ;;  %v154_v6 = vld [vmem:[#allocation7 + $0xe8] sm:$0xff]  ;;  %183 = vmatpush.msra.mxu2 %v156_v4  ;;  %v151_v8 = vld [vmem:[#allocation7 + $0xd0] sm:$0xff] }
  0x17   :  { %114 = vmatpush.msra.mxu0 %v94_v1  ;;  %v92_v7 = vld [vmem:[#allocation5 + $0x18] sm:$0xff]  ;;  %v152_v9 = vld [vmem:[#allocation7 + $0xd8] sm:$0xff]  ;;  %v150_v12 = vld [vmem:[#allocation7 + $0xc8] sm:$0xff] }
  0x18   :  { %164 = vmatpush.msra.mxu1 %v153_v5  ;;  %v91_v10 = vld [vmem:[#allocation5 + $0x10] sm:$0xff]  ;;  %184 = vmatpush.msra.mxu2 %v154_v6  ;;  %v149_v11 = vld [vmem:[#allocation7 + $0xc0] sm:$0xff]  ;;  %v90_v13 = vld [vmem:[#allocation5 + $0x8] sm:$0xff] }
  0x19   :  { %115 = vmatpush.msra.mxu0 %v93_v2  ;;  %v147_v14 = vld [vmem:[#allocation7 + $0xb0] sm:$0xff]  ;;  %v148_v15 = vld [vmem:[#allocation7 + $0xb8] sm:$0xff]  ;;  %v89_v16 = vld [vmem:[#allocation5] sm:$0xff] }
  0x1a   :  { %165 = vmatpush.msra.mxu1 %v151_v8  ;;  %185 = vmatpush.msra.mxu2 %v152_v9  ;;  %v145_v17 = vld [vmem:[#allocation7 + $0xa0] sm:$0xff]  ;;  %v146_v19 = vld [vmem:[#allocation7 + $0xa8] sm:$0xff]  ;;  %v143_v20 = vld [vmem:[#allocation7 + $0x90] sm:$0xff] }
  0x1b   :  { %116 = vmatpush.msra.mxu0 %v92_v7  ;;  %v88_v18 = vld [vmem:[#allocation2] sm:$0xff]  ;;  %v144_v21 = vld [vmem:[#allocation7 + $0x98] sm:$0xff]  ;;  %v142_v23 = vld [vmem:[#allocation7 + $0x88] sm:$0xff] }
  0x1c   :  { %166 = vmatpush.msra.mxu1 %v149_v11  ;;  %186 = vmatpush.msra.mxu2 %v150_v12  ;;  %v141_v22 = vld [vmem:[#allocation7 + $0x80] sm:$0xff]  ;;  %v139_v24 = vld [vmem:[#allocation7 + $0x70] sm:$0xff]  ;;  %v140_v25 = vld [vmem:[#allocation7 + $0x78] sm:$0xff] }
  0x1d   :  { %117 = vmatpush.msra.mxu0 %v91_v10  ;;  %v137_v26 = vld [vmem:[#allocation7 + $0x60] sm:$0xff]  ;;  %v138_v27 = vld [vmem:[#allocation7 + $0x68] sm:$0xff]  ;;  %v135_v28 = vld [vmem:[#allocation7 + $0x50] sm:$0xff] }
  0x1e   :  { %167 = vmatpush.msra.mxu1 %v147_v14  ;;  %187 = vmatpush.msra.mxu2 %v148_v15  ;;  %v136_v29 = vld [vmem:[#allocation7 + $0x58] sm:$0xff]  ;;  %v133_v30 = vld [vmem:[#allocation7 + $0x40] sm:$0xff]  ;;  %v134_v31 = vld [vmem:[#allocation7 + $0x48] sm:$0xff] }
  0x1f   :  { %118 = vmatpush.msra.mxu0 %v90_v13  ;;  %v131_v32 = vld [vmem:[#allocation7 + $0x30] sm:$0xff]  ;;  %v132_v33 = vld [vmem:[#allocation7 + $0x38] sm:$0xff]  ;;  %v129_v34 = vld [vmem:[#allocation7 + $0x20] sm:$0xff] }
  0x20   :  { %168 = vmatpush.msra.mxu1 %v145_v17  ;;  %188 = vmatpush.msra.mxu2 %v146_v19  ;;  %v130_v35 = vld [vmem:[#allocation7 + $0x28] sm:$0xff]  ;;  %v127_v36 = vld [vmem:[#allocation7 + $0x10] sm:$0xff]  ;;  %v128_v37 = vld [vmem:[#allocation7 + $0x18] sm:$0xff] }
  0x21   :  { %119 = vmatpush.msra.mxu0 %v89_v16  ;;  %v125_v38 = vld [vmem:[#allocation7] sm:$0xff]  ;;  %v126_v39 = vld [vmem:[#allocation7 + $0x8] sm:$0xff]  ;;  %v220_v40 = vld [vmem:[#allocation8 + $0x78] sm:$0xff] }
  0x22   :  { %301 = vmatmul.msk.f32.vlgmr.msra.gmra.mxu0 %vm100_vm0, %v88_v18  ;;  %169 = vmatpush.msra.mxu1 %v143_v20  ;;  %v219_v41 = vld [vmem:[#allocation8 + $0x70] sm:$0xff]  ;;  %v236_v42 = vld [vmem:[#allocation8 + $0xf8] sm:$0xff]  ;;  %v218_v43 = vld [vmem:[#allocation8 + $0x68] sm:$0xff] }
  0x23   :  { %189 = vmatpush.msra.mxu2 %v144_v21  ;;  %241 = vmatpush.msra.mxu3 %v220_v40  ;;  %v235_v44 = vld [vmem:[#allocation8 + $0xf0] sm:$0xff]  ;;  %v234_v45 = vld [vmem:[#allocation8 + $0xe8] sm:$0xff]  ;;  %v217_v46 = vld [vmem:[#allocation8 + $0x60] sm:$0xff] }
  0x24   :  { %170 = vmatpush.msra.mxu1 %v141_v22  ;;  %261 = vmatpush.msrb.mxu0 %v236_v42  ;;  %v233_v47 = vld [vmem:[#allocation8 + $0xe0] sm:$0xff]  ;;  %v216_v48 = vld [vmem:[#allocation8 + $0x58] sm:$0xff]  ;;  %v215_v50 = vld [vmem:[#allocation8 + $0x50] sm:$0xff] }
  0x25   :  { %190 = vmatpush.msra.mxu2 %v142_v23  ;;  %242 = vmatpush.msra.mxu3 %v219_v41  ;;  %v232_v49 = vld [vmem:[#allocation8 + $0xd8] sm:$0xff]  ;;  %v231_v51 = vld [vmem:[#allocation8 + $0xd0] sm:$0xff]  ;;  %v214_v52 = vld [vmem:[#allocation8 + $0x48] sm:$0xff] }
  0x26   :  { %171 = vmatpush.msra.mxu1 %v139_v24  ;;  %262 = vmatpush.msrb.mxu0 %v235_v44  ;;  %v230_v53 = vld [vmem:[#allocation8 + $0xc8] sm:$0xff]  ;;  %v213_v54 = vld [vmem:[#allocation8 + $0x40] sm:$0xff]  ;;  %v212_v56 = vld [vmem:[#allocation8 + $0x38] sm:$0xff] }
  0x27   :  { %191 = vmatpush.msra.mxu2 %v140_v25  ;;  %243 = vmatpush.msra.mxu3 %v218_v43  ;;  %v229_v55 = vld [vmem:[#allocation8 + $0xc0] sm:$0xff]  ;;  %v228_v57 = vld [vmem:[#allocation8 + $0xb8] sm:$0xff]  ;;  %v211_v58 = vld [vmem:[#allocation8 + $0x30] sm:$0xff] }
  0x28   :  { %172 = vmatpush.msra.mxu1 %v137_v26  ;;  %263 = vmatpush.msrb.mxu0 %v234_v45  ;;  %v227_v59 = vld [vmem:[#allocation8 + $0xb0] sm:$0xff]  ;;  %v210_v60 = vld [vmem:[#allocation8 + $0x28] sm:$0xff]  ;;  %v209_v61 = vld [vmem:[#allocation8 + $0x20] sm:$0xff] }
  0x29   :  { %192 = vmatpush.msra.mxu2 %v138_v27  ;;  %244 = vmatpush.msra.mxu3 %v217_v46  ;;  %v208_v62 = vld [vmem:[#allocation8 + $0x18] sm:$0xff]  ;;  %v311_v63 = vld [vmem:[%s516_s2] ss:$0 sm:$0xff]  ;;  %v207_v3 = vld [vmem:[#allocation8 + $0x10] sm:$0xff] }
  0x2a   :  { %173 = vmatpush.msra.mxu1 %v135_v28  ;;  %264 = vmatpush.msrb.mxu0 %v233_v47  ;;  %v226_v4 = vld [vmem:[#allocation8 + $0xa8] sm:$0xff]  ;;  %v225_v6 = vld [vmem:[#allocation8 + $0xa0] sm:$0xff]  ;;  %v224_v8 = vld [vmem:[#allocation8 + $0x98] sm:$0xff] }
  0x2b   :  { %193 = vmatpush.msra.mxu2 %v136_v29  ;;  %245 = vmatpush.msra.mxu3 %v216_v48  ;;  %v206_v5 = vld [vmem:[#allocation8 + $0x8] sm:$0xff]  ;;  %v205_v7 = vld [vmem:[#allocation8] sm:$0xff]  ;;  %v223_v9 = vld [vmem:[#allocation8 + $0x90] sm:$0xff] }
  0x2c   :  { %174 = vmatpush.msra.mxu1 %v133_v30  ;;  %265 = vmatpush.msrb.mxu0 %v232_v49  ;;  %v222_v10 = vld [vmem:[#allocation8 + $0x88] sm:$0xff]  ;;  %v221_v11 = vld [vmem:[#allocation8 + $0x80] sm:$0xff] }
  0x2d   :  { %194 = vmatpush.msra.mxu2 %v134_v31  ;;  %246 = vmatpush.msra.mxu3 %v215_v50  ;;  %v157_v12 = vld [vmem:[%s518_s4] sm:$0x3]  ;;  %s289_s4 = sshll.u32 %s521_s7, 4  ;;  %s290_s4 = int_to_ptr.hbm [resolvable:$true] %s289_s4 }
  0x2e   :  { %175 = vmatpush.msra.mxu1 %v131_v32  ;;  %266 = vmatpush.msrb.mxu0 %v231_v51  ;;  %v159_v13 = vperm.slane %v157_v12, 0  ;;  %v160_v17 = vperm.slane %v157_v12, 1  ;;  %v312_v21 = vld [vmem:[%s520_s6] ss:$0 sm:$0xff] }
  0x2f   :  { %195 = vmatpush.msra.mxu2 %v132_v33  ;;  %247 = vmatpush.msra.mxu3 %v214_v52 }
  0x30   :  { %176 = vmatpush.msra.mxu1 %v129_v34  ;;  %267 = vmatpush.msrb.mxu0 %v230_v53 }
  0x31   :  { %196 = vmatpush.msra.mxu2 %v130_v35  ;;  %248 = vmatpush.msra.mxu3 %v213_v54 }
  0x32   :  { %177 = vmatpush.msra.mxu1 %v127_v36  ;;  %268 = vmatpush.msrb.mxu0 %v229_v55 }
  0x33   :  { %197 = vmatpush.msra.mxu2 %v128_v37  ;;  %249 = vmatpush.msra.mxu3 %v212_v56 }
  0x34   :  { %178 = vmatpush.msra.mxu1 %v125_v38  ;;  %269 = vmatpush.msrb.mxu0 %v228_v57 }
  0x35   :  { %198 = vmatpush.msra.mxu2 %v126_v39  ;;  %250 = vmatpush.msra.mxu3 %v211_v58 }
  0x36   :  { %270 = vmatpush.msrb.mxu0 %v227_v59 }
  0x37   :  { %251 = vmatpush.msra.mxu3 %v210_v60 }
  0x38   :  { %271 = vmatpush.msrb.mxu0 %v226_v4 }
  0x39   :  { %252 = vmatpush.msra.mxu3 %v209_v61 }
  0x3a   :  { %272 = vmatpush.msrb.mxu0 %v225_v6 }
  0x3b   :  { %253 = vmatpush.msra.mxu3 %v208_v62 }
  0x3c   :  { %273 = vmatpush.msrb.mxu0 %v224_v8 }
  0x3d   :  { %254 = vmatpush.msra.mxu3 %v207_v3 }
  0x3e   :  { %274 = vmatpush.msrb.mxu0 %v223_v9 }
  0x3f   :  { %255 = vmatpush.msra.mxu3 %v206_v5 }
  0x40   :  { %275 = vmatpush.msrb.mxu0 %v222_v10 }
  0x41   :  { %256 = vmatpush.msra.mxu3 %v205_v7 }
  0x42   :  { %276 = vmatpush.msrb.mxu0 %v221_v11 }
  0x9f   :  { %v121_v0 = vpop.f32.mrf.mxu0 }
  0xa0   :  { %v122_v1 = vadd.f32 %v311_v63, %v121_v0 }
  0xa2   :  { %v124_v2 = vmax.f32 %v122_v1, 0.0 }
  0xa4   :  { %179 = vmatmul.f32.vlgmr.msra.gmra.mxu1 %v124_v2  ;;  %199 = vmatmul.f32.vlgmr.msra.gmra.mxu2 %v124_v2 }
 0x121   :  { %v180_v14 = vpop.f32.mrf.mxu1 }
 0x122   :  { %v181_v15 = vadd.f32 %v180_v14, %v159_v13 }
 0x124   :  { %v203_v16 = vmax.f32 %v181_v15, 0.0 }
 0x126   :  { %257 = vmatmul.f32.vlgmr.msra.gmra.mxu3 %v203_v16 }
 0x127   :  { %v200_v18 = vpop.f32.mrf.mxu2 }
 0x128   :  { %v201_v19 = vadd.f32 %v200_v18, %v160_v17 }
 0x12a   :  { %v204_v20 = vmax.f32 %v201_v19, 0.0 }
 0x12c   :  { %277 = vmatmul.f32.vlgmr.msrb.gmra.mxu0 %v204_v20 }
 0x1a9   :  { %v258_v22 = vpop.f32.mrf.mxu3  ;;  %v278_v24 = vpop.f32.mrf.mxu0 }
 0x1aa   :  { %v259_v23 = vadd.f32 %v312_v21, %v258_v22 }
 0x1ac   :  { %v279_v25 = vadd.f32 %v278_v24, %v259_v23 }
 0x1ae   :  { %281 = vst [vmem:[#allocation10] sm:$0xff] %v279_v25 }
 0x1af   :  { %292 = dma.vmem_to_hbm [thread:$0]  %s288_s27, 128, %s290_s4, [#allocation4]  }
 0x1b0   :  { %439 = dma.done.wait [#allocation4], 128  }
 0x1b1   :  { %440 = vsyncadd [#allocation4], 4294967168 }
 0x1b2   :  { %297 = vsyncpa [#allocation3], 1 }
 0x1b3   :  { %298 = vsyncpa [#allocation6], 1 }
 0x1b4   :  { %299 = vsyncpa [#allocation9], 1 }
 0x1b5   :  { %300 = vsyncpa [#allocation4], 1 }

</bundles_post_ra>
